<compile_context>
chip_gen: v5e
topology: v5e:2x2
jax: 0.10.0
libtpu: 0.0.40
codegen_flags: <defaults>
</compile_context>

<pallas_src>
import math
import functools

import jax
import jax.numpy as jnp
from jax.experimental import pallas as pl
from jax.experimental.pallas import tpu as pltpu


def _round_up(n, m):
    return ((n + m - 1) // m) * m


def _ffn_kernel(x_ref, w1_ref, b1_ref, w2_ref, b2_ref, o_ref, *, compute_dtype):
    # x_ref: (tm, E), w1_ref: (E, H), b1_ref: (1, H), w2_ref: (H, 1), b2_ref: (1, 1)
    x = x_ref[...].astype(compute_dtype)
    w1 = w1_ref[...].astype(compute_dtype)
    w2 = w2_ref[...].astype(compute_dtype)

    # Linear(E -> H) + ReLU   (MXU matmul in compute_dtype, f32 accumulation)
    h = jnp.dot(x, w1, preferred_element_type=jnp.float32) + b1_ref[...]
    h = jnp.maximum(h, 0.0)

    # Linear(H -> 1) + Sigmoid
    y = jnp.dot(h.astype(compute_dtype), w2,
                preferred_element_type=jnp.float32) + b2_ref[...]
    o_ref[...] = jax.nn.sigmoid(y).astype(o_ref.dtype)


def ffn_pallas(x, params, *, compute_dtype=jnp.bfloat16, block_rows=512):
    """x: (..., E)  ->  (..., 1), matching the PyTorch FFN forward."""
    E = x.shape[-1]
    lead = x.shape[:-1]
    x2 = x.reshape(-1, E)
    R = x2.shape[0]

    w1, b1, w2, b2 = params["w1"], params["b1"], params["w2"], params["b2"]
    H = w1.shape[1]

    # Row tile: big tiles amortize per-step overhead; pad rows to a tile multiple.
    tm = block_rows if R >= block_rows else _round_up(R, 8)
    R_pad = _round_up(R, tm)
    if R_pad != R:
        x2 = jnp.pad(x2, ((0, R_pad - R), (0, 0)))

    kernel = functools.partial(_ffn_kernel, compute_dtype=compute_dtype)

    # VMEM estimate: double-buffered x/out tiles + weights + hidden intermediate.
    est = 4 * (2 * tm * (E + 1) + 2 * (E * H + 2 * H + 2) + tm * H)
    vmem_limit = int(min(96 * 2**20, max(32 * 2**20, 2 * est)))

    out = pl.pallas_call(
        kernel,
        out_shape=jax.ShapeDtypeStruct((R_pad, 1), x.dtype),
        grid_spec=pltpu.PrefetchScalarGridSpec(
            num_scalar_prefetch=0,
            grid=(R_pad // tm,),
            in_specs=[
                pl.BlockSpec((tm, E), lambda i: (i, 0)),   # x rows (tiled)
                pl.BlockSpec((E, H), lambda i: (0, 0)),    # w1 (grid-constant)
                pl.BlockSpec((1, H), lambda i: (0, 0)),    # b1
                pl.BlockSpec((H, 1), lambda i: (0, 0)),    # w2
                pl.BlockSpec((1, 1), lambda i: (0, 0)),    # b2
            ],
            out_specs=pl.BlockSpec((tm, 1), lambda i: (i, 0)),
        ),
        compiler_params=pltpu.CompilerParams(
            dimension_semantics=("parallel",),
            vmem_limit_bytes=vmem_limit,
        ),
    )(x2, w1, b1, w2, b2)

    return out[:R].reshape(*lead, 1)


def ffn_ref(x, params):
    """Pure-JAX reference of the PyTorch FFN forward (f32)."""
    h = jnp.maximum(x @ params["w1"] + params["b1"], 0.0)
    y = h @ params["w2"] + params["b2"]
    return jax.nn.sigmoid(y)


def init_params(key, embed_dim, hidden=256):
    """nn.Linear-shaped params, stored pre-transposed: w1 (E,H), w2 (H,1)."""
    k1, k2, k3, k4 = jax.random.split(key, 4)
    s1 = 1.0 / math.sqrt(embed_dim)
    s2 = 1.0 / math.sqrt(hidden)
    w1 = jax.random.uniform(k1, (embed_dim, hidden), jnp.float32, -s1, s1)
    b1 = jax.random.uniform(k2, (1, hidden), jnp.float32, -s1, s1)
    w2 = jax.random.uniform(k3, (hidden, 1), jnp.float32, -s2, s2)
    b2 = jax.random.uniform(k4, (1, 1), jnp.float32, -s2, s2)
    return dict(w1=w1, b1=b1, w2=w2, b2=b2)


if __name__ == "__main__":
    B, L, embed_dim = 2, 8, 32   # small shapes consistent with the module

    key = jax.random.PRNGKey(0)
    k_x, k_p = jax.random.split(key)
    x = jax.random.normal(k_x, (B, L, embed_dim), jnp.float32)
    params = init_params(k_p, embed_dim)

    expected = ffn_ref(x, params)

    # Performance path: bf16 MXU matmuls with f32 accumulation.
    out = ffn_pallas(x, params)  # compute_dtype=bf16 (default)
    out = jax.block_until_ready(out)
    assert out.shape == (B, L, 1)
    assert jnp.allclose(out, expected, atol=2e-2, rtol=0.0), "bf16 kernel mismatch"

    # Exactness check of the kernel structure itself in f32.
    out_f32 = ffn_pallas(x, params, compute_dtype=jnp.float32)
    out_f32 = jax.block_until_ready(out_f32)
    assert jnp.allclose(out_f32, expected, atol=1e-5, rtol=1e-5), "f32 kernel mismatch"

    print("KERNEL_OK")
</pallas_src>

<mosaic_0001>
module attributes {stable_mosaic.version = 11 : i64} {
  func.func @_ffn_kernel(%arg0: i32, %arg1: memref<16x32xf32, #tpu.memory_space<vmem>>, %arg2: memref<32x256xf32, #tpu.memory_space<vmem>>, %arg3: memref<1x256xf32, #tpu.memory_space<vmem>>, %arg4: memref<256x1xf32, #tpu.memory_space<vmem>>, %arg5: memref<1x1xf32, #tpu.memory_space<vmem>>, %arg6: memref<16x1xf32, #tpu.memory_space<vmem>>) attributes {dimension_semantics = [#tpu.dimension_semantics<parallel>], iteration_bounds = array<i64: 1>, scalar_prefetch = 0 : i64, scratch_operands = 0 : i64, tpu.core_type = #tpu.core_type<tc>, window_params = [{transform_indices = @transform_0, window_bounds = array<i64: 16, 32>}, {pipeline_mode = #tpu.pipeline_mode<synchronous>, transform_indices = @transform_1, window_bounds = array<i64: 32, 256>}, {pipeline_mode = #tpu.pipeline_mode<synchronous>, transform_indices = @transform_2, window_bounds = array<i64: 1, 256>}, {pipeline_mode = #tpu.pipeline_mode<synchronous>, transform_indices = @transform_3, window_bounds = array<i64: 256, 1>}, {pipeline_mode = #tpu.pipeline_mode<synchronous>, transform_indices = @transform_4, window_bounds = array<i64: 1, 1>}, {transform_indices = @transform_5, window_bounds = array<i64: 16, 1>}]} {
    %c0 = arith.constant 0 : index
    %c0_0 = arith.constant 0 : index
    %0 = vector.load %arg1[%c0, %c0_0] : memref<16x32xf32, #tpu.memory_space<vmem>>, vector<16x32xf32>
    %1 = arith.truncf %0 : vector<16x32xf32> to vector<16x32xbf16>
    %c0_1 = arith.constant 0 : index
    %c0_2 = arith.constant 0 : index
    %2 = vector.load %arg2[%c0_1, %c0_2] : memref<32x256xf32, #tpu.memory_space<vmem>>, vector<32x256xf32>
    %3 = arith.truncf %2 : vector<32x256xf32> to vector<32x256xbf16>
    %c0_3 = arith.constant 0 : index
    %c0_4 = arith.constant 0 : index
    %4 = vector.load %arg4[%c0_3, %c0_4] : memref<256x1xf32, #tpu.memory_space<vmem>>, vector<256x1xf32>
    %5 = arith.truncf %4 : vector<256x1xf32> to vector<256x1xbf16>
    %cst = arith.constant dense<0.000000e+00> : vector<16x256xf32>
    %6 = tpu.matmul %1, %3, %cst {dimension_numbers = #tpu.dot_dimension_numbers<[1], [0], [0], [1], [0, 0, 1, 1], [], []>} : vector<16x32xbf16>, vector<32x256xbf16>, vector<16x256xf32> -> vector<16x256xf32>
    %c0_5 = arith.constant 0 : index
    %c0_6 = arith.constant 0 : index
    %7 = vector.load %arg3[%c0_5, %c0_6] : memref<1x256xf32, #tpu.memory_space<vmem>>, vector<1x256xf32>
    %8 = vector.broadcast %7 : vector<1x256xf32> to vector<16x256xf32>
    %9 = arith.addf %6, %8 : vector<16x256xf32>
    %cst_7 = arith.constant 0.000000e+00 : f32
    %10 = vector.broadcast %cst_7 : f32 to vector<16x256xf32>
    %11 = arith.maximumf %9, %10 : vector<16x256xf32>
    %12 = arith.truncf %11 : vector<16x256xf32> to vector<16x256xbf16>
    %cst_8 = arith.constant dense<0.000000e+00> : vector<16x1xf32>
    %13 = tpu.matmul %12, %5, %cst_8 {dimension_numbers = #tpu.dot_dimension_numbers<[1], [0], [0], [1], [0, 0, 1, 1], [], []>} : vector<16x256xbf16>, vector<256x1xbf16>, vector<16x1xf32> -> vector<16x1xf32>
    %c0_9 = arith.constant 0 : index
    %c0_10 = arith.constant 0 : index
    %14 = vector.load %arg5[%c0_9, %c0_10] : memref<1x1xf32, #tpu.memory_space<vmem>>, vector<1x1xf32>
    %15 = vector.broadcast %14 : vector<1x1xf32> to vector<16x1xf32>
    %16 = arith.addf %13, %15 : vector<16x1xf32>
    %17 = arith.negf %16 : vector<16x1xf32>
    %18 = math.exp %17 : vector<16x1xf32>
    %cst_11 = arith.constant 1.000000e+00 : f32
    %19 = vector.broadcast %cst_11 : f32 to vector<16x1xf32>
    %20 = arith.addf %19, %18 : vector<16x1xf32>
    %21 = arith.divf %19, %20 : vector<16x1xf32>
    %c0_12 = arith.constant 0 : index
    %c0_13 = arith.constant 0 : index
    %22 = vector.load %arg6[%c0_12, %c0_13] : memref<16x1xf32, #tpu.memory_space<vmem>>, vector<16x1xf32>
    tpu.vector_store %arg6[%c0_12, %c0_13], %21 {strides = array<i32>} : memref<16x1xf32, #tpu.memory_space<vmem>>, vector<16x1xf32>,
    return
  }
  func.func @transform_0(%arg0: i32) -> (i32, i32) {
    %c0_i32 = arith.constant 0 : i32
    %c0_i32_0 = arith.constant 0 : i32
    return %arg0, %c0_i32 : i32, i32
  }
  func.func @transform_1(%arg0: i32) -> (i32, i32) {
    %c0_i32 = arith.constant 0 : i32
    %c0_i32_0 = arith.constant 0 : i32
    %c0_i32_1 = arith.constant 0 : i32
    return %c0_i32, %c0_i32_0 : i32, i32
  }
  func.func @transform_2(%arg0: i32) -> (i32, i32) {
    %c0_i32 = arith.constant 0 : i32
    %c0_i32_0 = arith.constant 0 : i32
    %c0_i32_1 = arith.constant 0 : i32
    return %c0_i32, %c0_i32_0 : i32, i32
  }
  func.func @transform_3(%arg0: i32) -> (i32, i32) {
    %c0_i32 = arith.constant 0 : i32
    %c0_i32_0 = arith.constant 0 : i32
    %c0_i32_1 = arith.constant 0 : i32
    return %c0_i32, %c0_i32_0 : i32, i32
  }
  func.func @transform_4(%arg0: i32) -> (i32, i32) {
    %c0_i32 = arith.constant 0 : i32
    %c0_i32_0 = arith.constant 0 : i32
    %c0_i32_1 = arith.constant 0 : i32
    return %c0_i32, %c0_i32_0 : i32, i32
  }
  func.func @transform_5(%arg0: i32) -> (i32, i32) {
    %c0_i32 = arith.constant 0 : i32
    %c0_i32_0 = arith.constant 0 : i32
    return %arg0, %c0_i32 : i32, i32
  }
}

</mosaic_0001>

<bundles_post_ra>
// kernel: tpu_custom_call.1
= control target key start
LH: loop header
LB: loop body
LE: loop exit
PB: predicated region body
PF: predicated region fallthrough
CT: control target
= control target key end

     0   :  { %vm92_vm0 = vcmask 261120   ;;  %vm200_vm4 = vcmask 7168   ;;  %s390_s1 = inlined_call_operand.vmem [shape: f32[32,256], index: 1, kind: input, shape index: {}]   ;;  %s391_s0 = inlined_call_operand.vmem [shape: f32[16,32], index: 0, kind: input, shape index: {}]   ;;  %s392_s3 = inlined_call_operand.vmem [shape: f32[256,1], index: 3, kind: input, shape index: {}]   ;;  %s393_s4 = inlined_call_operand.<no memory space> [shape: f32[1,1], index: 4, kind: input, shape index: {}]   ;;  %s394_s2 = inlined_call_operand.vmem [shape: f32[1,256], index: 2, kind: input, shape index: {}]   ;;  %s395_s5 = inlined_call_operand.vmem [shape: f32[16,1], index: 5, kind: output, shape index: {}]  }
   0x1   :  { %v30_v0 = vld [vmem:[%s390_s1 + $0x20] sm:$0xff]  ;;  %v32_v1 = vld [vmem:[%s390_s1 + $0x30] sm:$0xff]  ;;  %v31_v2 = vld [vmem:[%s390_s1 + $0x28] sm:$0xff]  ;;  %v10_v63 = vstv %s393_s4 }
   0x2   :  { %v36_v3 = vpack.c.bf16 %v32_v1, %v30_v0  ;;  %v33_v4 = vld [vmem:[%s390_s1 + $0x38] sm:$0xff]  ;;  %v26_v5 = vld [vmem:[%s390_s1] sm:$0xff]  ;;  %v28_v6 = vld [vmem:[%s390_s1 + $0x10] sm:$0xff]  ;;  %11 = vst [vmem:[#allocation2] sm:$0x1] %v10_v63 }
   0x3   :  { %v37_v7 = vpack.c.bf16 %v33_v4, %v31_v2  ;;  %v27_v8 = vld [vmem:[%s390_s1 + $0x8] sm:$0xff]  ;;  %v29_v9 = vld [vmem:[%s390_s1 + $0x18] sm:$0xff]  ;;  %v23_v10 = vld [vmem:[%s391_s0] sm:$0xff]  ;;  %v34_v11 = vpack.c.bf16 %v28_v6, %v26_v5 }
   0x4   :  { %102 = vmatpush.bf16.msra.mxu0 %v36_v3  ;;  %v24_v12 = vld [vmem:[%s391_s0 + $0x8] sm:$0xff]  ;;  %v52_v13 = vld [vmem:[%s392_s3 + $0x70] sm:$0xff]  ;;  %v53_v14 = vld [vmem:[%s392_s3 + $0x78] sm:$0xff]  ;;  %v35_v15 = vpack.c.bf16 %v29_v9, %v27_v8 }
   0x5   :  { %116 = vmatpush.bf16.msra.mxu1 %v37_v7  ;;  %v77_v16 = vpack.c.bf16 %v53_v14, %v52_v13  ;;  %v68_v17 = vld [vmem:[%s392_s3 + $0xf0] sm:$0xff]  ;;  %v69_v18 = vld [vmem:[%s392_s3 + $0xf8] sm:$0xff]  ;;  %v50_v19 = vld [vmem:[%s392_s3 + $0x60] sm:$0xff]  ;;  %v25_v24 = vpack.c.bf16 %v24_v12, %v23_v10 }
   0x6   :  { %v85_v20 = vpack.c.bf16 %v69_v18, %v68_v17  ;;  %v51_v21 = vld [vmem:[%s392_s3 + $0x68] sm:$0xff]  ;;  %v66_v22 = vld [vmem:[%s392_s3 + $0xe0] sm:$0xff]  ;;  %v48_v27 = vld [vmem:[%s392_s3 + $0x50] sm:$0xff] }
   0x7   :  { %v67_v23 = vld [vmem:[%s392_s3 + $0xe8] sm:$0xff]  ;;  %134 = vmatpush.bf16.msra.mxu2 %v77_v16  ;;  %v76_v25 = vpack.c.bf16 %v51_v21, %v50_v19  ;;  %v49_v28 = vld [vmem:[%s392_s3 + $0x58] sm:$0xff]  ;;  %v64_v29 = vld [vmem:[%s392_s3 + $0xd0] sm:$0xff] }
   0x8   :  { %103 = vmatpush.bf16.msra.mxu0 %v34_v11  ;;  %148 = vmatpush.bf16.msra.mxu3 %v85_v20  ;;  %v84_v26 = vpack.c.bf16 %v67_v23, %v66_v22  ;;  %v65_v30 = vld [vmem:[%s392_s3 + $0xd8] sm:$0xff]  ;;  %v75_v31 = vpack.c.bf16 %v49_v28, %v48_v27  ;;  %v46_v33 = vld [vmem:[%s392_s3 + $0x40] sm:$0xff]  ;;  %v47_v34 = vld [vmem:[%s392_s3 + $0x48] sm:$0xff] }
   0x9   :  { %117 = vmatpush.bf16.msra.mxu1 %v35_v15  ;;  %v83_v32 = vpack.c.bf16 %v65_v30, %v64_v29  ;;  %v62_v35 = vld [vmem:[%s392_s3 + $0xc0] sm:$0xff]  ;;  %v63_v36 = vld [vmem:[%s392_s3 + $0xc8] sm:$0xff]  ;;  %v74_v37 = vpack.c.bf16 %v47_v34, %v46_v33  ;;  %v44_v39 = vld [vmem:[%s392_s3 + $0x30] sm:$0xff] }
   0xa   :  { %v82_v38 = vpack.c.bf16 %v63_v36, %v62_v35  ;;  %v45_v40 = vld [vmem:[%s392_s3 + $0x38] sm:$0xff]  ;;  %v60_v41 = vld [vmem:[%s392_s3 + $0xb0] sm:$0xff]  ;;  %v42_v45 = vld [vmem:[%s392_s3 + $0x20] sm:$0xff] }
   0xb   :  { %207 = vmatmul.msk.bf16.vlgmr.msra.gmra.mxu0 %vm92_vm0, %v25_v24  ;;  %135 = vmatpush.bf16.msra.mxu2 %v76_v25  ;;  %v73_v42 = vpack.c.bf16 %v45_v40, %v44_v39  ;;  %v61_v43 = vld [vmem:[%s392_s3 + $0xb8] sm:$0xff]  ;;  %v43_v46 = vld [vmem:[%s392_s3 + $0x28] sm:$0xff]  ;;  %v58_v47 = vld [vmem:[%s392_s3 + $0xa0] sm:$0xff] }
   0xc   :  { %208 = vmatmul.msk.bf16.vlgmr.msra.gmra.mxu1 %vm92_vm0, %v25_v24  ;;  %149 = vmatpush.bf16.msra.mxu3 %v84_v26  ;;  %v81_v44 = vpack.c.bf16 %v61_v43, %v60_v41  ;;  %v72_v48 = vpack.c.bf16 %v43_v46, %v42_v45  ;;  %v59_v49 = vld [vmem:[%s392_s3 + $0xa8] sm:$0xff]  ;;  %v40_v51 = vld [vmem:[%s392_s3 + $0x10] sm:$0xff]  ;;  %v41_v52 = vld [vmem:[%s392_s3 + $0x18] sm:$0xff] }
   0xd   :  { %v80_v50 = vpack.c.bf16 %v59_v49, %v58_v47  ;;  %v56_v53 = vld [vmem:[%s392_s3 + $0x90] sm:$0xff]  ;;  %v71_v54 = vpack.c.bf16 %v41_v52, %v40_v51  ;;  %v57_v55 = vld [vmem:[%s392_s3 + $0x98] sm:$0xff]  ;;  %v38_v57 = vld [vmem:[%s392_s3] sm:$0xff] }
   0xe   :  { %v79_v56 = vpack.c.bf16 %v57_v55, %v56_v53  ;;  %v39_v58 = vld [vmem:[%s392_s3 + $0x8] sm:$0xff]  ;;  %v54_v59 = vld [vmem:[%s392_s3 + $0x80] sm:$0xff] }
   0xf   :  { %136 = vmatpush.bf16.msra.mxu2 %v75_v31  ;;  %v70_v60 = vpack.c.bf16 %v39_v58, %v38_v57  ;;  %v55_v61 = vld [vmem:[%s392_s3 + $0x88] sm:$0xff]  ;;  %v86_v0 = vld [vmem:[%s394_s2] sm:$0x3] }
  0x10   :  { %150 = vmatpush.bf16.msra.mxu3 %v83_v32  ;;  %v78_v62 = vpack.c.bf16 %v55_v61, %v54_v59  ;;  %v88_v3 = vperm.slane %v86_v0, 0  ;;  %v89_v4 = vperm.slane %v86_v0, 1  ;;  %v211_v17 = vld [vmem:[#allocation2] ss:$0 sm:$0xff] }
  0x13   :  { %137 = vmatpush.bf16.msra.mxu2 %v74_v37 }
  0x14   :  { %151 = vmatpush.bf16.msra.mxu3 %v82_v38 }
  0x17   :  { %138 = vmatpush.bf16.msra.mxu2 %v73_v42 }
  0x18   :  { %152 = vmatpush.bf16.msra.mxu3 %v81_v44 }
  0x1b   :  { %139 = vmatpush.bf16.msra.mxu2 %v72_v48 }
  0x1c   :  { %153 = vmatpush.bf16.msra.mxu3 %v80_v50 }
  0x1f   :  { %140 = vmatpush.bf16.msra.mxu2 %v71_v54 }
  0x20   :  { %154 = vmatpush.bf16.msra.mxu3 %v79_v56 }
  0x23   :  { %141 = vmatpush.bf16.msra.mxu2 %v70_v60 }
  0x24   :  { %155 = vmatpush.bf16.msra.mxu3 %v78_v62 }
  0x88   :  { %v105_v1 = vpop.f32.mrf.mxu0 }
  0x89   :  { %v119_v2 = vpop.f32.mrf.mxu1  ;;  %v106_v5 = vadd.f32 %v105_v1, %v88_v3 }
  0x8a   :  { %v120_v6 = vadd.f32 %v119_v2, %v89_v4 }
  0x8b   :  { %v124_v11 = vmax.f32 %v106_v5, 0.0 }
  0x8c   :  { %v125_v13 = vmax.f32 %v120_v6, 0.0 }
  0x90   :  { %v107_v7 = vpop.f32.mrf.mxu0 }
  0x91   :  { %v108_v8 = vadd.f32 %v107_v7, %v88_v3  ;;  %v121_v9 = vpop.f32.mrf.mxu1 }
  0x92   :  { %v122_v10 = vadd.f32 %v121_v9, %v89_v4 }
  0x93   :  { %v126_v12 = vmax.f32 %v108_v8, 0.0 }
  0x94   :  { %v127_v14 = vmax.f32 %v122_v10, 0.0 }
  0x95   :  { %v128_v15 = vpack.c.bf16 %v126_v12, %v124_v11 }
  0x96   :  { %v129_v16 = vpack.c.bf16 %v127_v14, %v125_v13 }
  0x97   :  { %142 = vmatmul.bf16.vlgmr.msra.gmra.mxu2 %v128_v15 }
  0x98   :  { %156 = vmatmul.bf16.vlgmr.msra.gmra.mxu3 %v129_v16 }
 0x11a   :  { %v143_v18 = vpop.f32.mrf.mxu2 }
 0x11b   :  { %v144_v19 = vadd.f32 %v211_v17, %v143_v18  ;;  %v157_v20 = vpop.f32.mrf.mxu3 }
 0x11d   :  { %v158_v21 = vadd.f32 %v157_v20, %v144_v19 }
 0x11f   :  { %v209_v22 = vmul.f32 -1.442695, %v158_v21 }
 0x121   :  { %212 = vpow2.f32 %v209_v22 }
 0x122   :  { %v145_v23 = vpop.f32.mrf.mxu2 }
 0x123   :  { %v146_v24 = vadd.f32 %v211_v17, %v145_v23  ;;  %v159_v25 = vpop.f32.mrf.mxu3 }
 0x125   :  { %v160_v26 = vadd.f32 %v159_v25, %v146_v24 }
 0x127   :  { %v213_v27 = vpop.eup %212  ;;  %v210_v28 = vmul.f32 -1.442695, %v160_v26 }
 0x128   :  { %v168_v29 = vadd.f32 1.0, %v213_v27 }
 0x129   :  { %214 = vpow2.f32 %v210_v28 }
 0x12a   :  { %216 = vrcp.f32 %v168_v29  ;;  %v181_v35 = vand.u32 2147483648, %v168_v29  ;;  %v179_v37 = vand.u32 2147483647, %v168_v29  ;;  %vm175_vm2 = vweird.f32 %v168_v29 }
 0x12c   :  { %v182_v40 = vor.u32 1.1754944e-38, %v181_v35  ;;  %vm180_vm5 = vcmp.eq.f32.partialorder %v179_v37, 8.507059e+37 }
 0x12f   :  { %v215_v30 = vpop.eup %214 }
 0x130   :  { %v217_v31 = vpop.eup %216  ;;  %v169_v32 = vadd.f32 1.0, %v215_v30 }
 0x131   :  { %v171_v33 = vmul.f32 %v217_v31, %v168_v29  ;;  %vm176_vm1 = vweird.f32 %v217_v31 }
 0x132   :  { %218 = vrcp.f32 %v169_v32  ;;  %vm177_vm3 = vmor %vm175_vm2, %vm176_vm1  ;;  %v196_v45 = vand.u32 2147483648, %v169_v32  ;;  %v194_v47 = vand.u32 2147483647, %v169_v32  ;;  %vm190_vm7 = vweird.f32 %v169_v32 }
 0x133   :  { %v172_v34 = vsub.f32 1.0, %v171_v33 }
 0x134   :  { %v197_v49 = vor.u32 1.1754944e-38, %v196_v45  ;;  %vm195_vm9 = vcmp.eq.f32.partialorder %v194_v47, 8.507059e+37 }
 0x135   :  { %v173_v36 = vmul.f32 %v217_v31, %v172_v34 }
 0x137   :  { %v174_v38 = vadd.f32 %v217_v31, %v173_v36 }
 0x138   :  { %v219_v39 = vpop.eup %218 }
 0x139   :  { %v178_v41 = vsel %vm177_vm3, %v217_v31, %v174_v38  ;;  %v186_v42 = vmul.f32 %v219_v39, %v169_v32  ;;  %vm191_vm6 = vweird.f32 %v219_v39 }
 0x13a   :  { %v183_v43 = vsel %vm180_vm5, %v182_v40, %v178_v41  ;;  %vm192_vm8 = vmor %vm190_vm7, %vm191_vm6 }
 0x13b   :  { %201 = vst.msk [vmem:[%s395_s5] sm:$0xff] %vm200_vm4, %v183_v43  ;;  %v187_v44 = vsub.f32 1.0, %v186_v42 }
 0x13d   :  { %v188_v46 = vmul.f32 %v219_v39, %v187_v44 }
 0x13f   :  { %v189_v48 = vadd.f32 %v219_v39, %v188_v46 }
 0x141   :  { %v193_v50 = vsel %vm192_vm8, %v219_v39, %v189_v48 }
 0x142   :  { %v198_v51 = vsel %vm195_vm9, %v197_v49, %v193_v50 }
 0x143   :  { %202 = vst.msk [vmem:[%s395_s5 + $0x8] sm:$0xff] %vm200_vm4, %v198_v51 }

</bundles_post_ra>
